<compile_context>
chip_gen: v6e
topology: v6e:2x2x1
jax: 0.10.0
libtpu: 0.0.40
codegen_flags: <defaults>
</compile_context>

<pallas_src>
import functools

import jax
import jax.numpy as jnp
from jax.experimental import pallas as pl
from jax.experimental.pallas import tpu as pltpu


def _round_up(x, m):
    return ((x + m - 1) // m) * m


def _cdiv(a, b):
    return -(-a // b)


def _default_silu_bf16():
    """bf16 VPU/EUP exists on v6e/v7x; keep f32 SiLU on v5e and older."""
    try:
        kind = jax.devices()[0].device_kind.lower()
    except Exception:
        return False
    return any(tag in kind for tag in ("v6", "v7", "7x", "trillium"))


def _silu(x):
    # SiLU(x) = x * sigmoid(x) = x * 0.5 * (1 + tanh(x / 2)):
    # one EUP push (tanh) per element instead of exp + reciprocal.
    return x * (0.5 * (jnp.tanh(0.5 * x) + 1.0))


def nn_q_kernel(x_ref, w1_ref, b1_ref, w2_ref, b2_ref, w3_ref, b3_ref, o_ref,
                *, out_size, silu_bf16):
    # x_ref: (TB, in) bf16 tile; weights bf16; biases f32 (b3 padded to 128n).
    x = x_ref[...]

    h1 = jnp.dot(x, w1_ref[...], preferred_element_type=jnp.float32) + b1_ref[...]
    h1 = _silu(h1.astype(jnp.bfloat16)) if silu_bf16 else _silu(h1).astype(jnp.bfloat16)

    h2 = jnp.dot(h1, w2_ref[...], preferred_element_type=jnp.float32) + b2_ref[...]
    h2 = _silu(h2.astype(jnp.bfloat16)) if silu_bf16 else _silu(h2).astype(jnp.bfloat16)

    out = jnp.dot(h2, w3_ref[...], preferred_element_type=jnp.float32) + b3_ref[...]
    # MXU dot ran at a lane-dense (128n) width; store only the real columns so
    # the HBM writeback is not amplified 32x.
    o_ref[...] = out[:, :out_size].astype(o_ref.dtype)


def prepare_params(params):
    """One-time conversion (outside the per-call hot path): bf16 [in,out]
    weights, f32 [1,out] biases, final layer padded to a 128-lane multiple
    for the in-kernel MXU dot."""
    w1, b1, w2, b2, w3, b3 = params
    hidden, out_size = w3.shape
    out_dot = _round_up(max(out_size, 1), 128)
    w3p = jnp.zeros((hidden, out_dot), jnp.bfloat16).at[:, :out_size].set(
        w3.astype(jnp.bfloat16))
    b3p = jnp.zeros((1, out_dot), jnp.float32).at[:, :out_size].set(
        b3.astype(jnp.float32))
    return (w1.astype(jnp.bfloat16), b1.astype(jnp.float32),
            w2.astype(jnp.bfloat16), b2.astype(jnp.float32),
            w3p, b3p)


@functools.partial(jax.jit, static_argnames=("out_size", "block_b", "silu_bf16"))
def nn_q_forward(state, params, *, out_size, block_b=2048, silu_bf16=None):
    """Pallas forward of NN_Q: fc1 -> SiLU -> fc2 -> SiLU -> fc3.

    `params` must come from prepare_params().  `out_size` is the number of
    real output columns (actions)."""
    if silu_bf16 is None:
        silu_bf16 = _default_silu_bf16()

    w1b, b1, w2b, b2, w3p, b3p = params
    B, in_size = state.shape

    # --- batch tiling ---------------------------------------------------
    # Minimum number of near-equal tiles of <= block_b rows (mult of 8); if a
    # single tile would carry a large batch, split in two so both TensorCores
    # get work on v7x (the batch axis is "parallel").
    B8 = _round_up(max(B, 1), 8)
    n_b = _cdiv(B8, max(_round_up(block_b, 8), 8))
    if n_b == 1 and B8 >= 1024:
        n_b = 2
    TB = _round_up(_cdiv(B8, n_b), 8)
    n_b = _cdiv(B8, TB)
    B_pad = n_b * TB

    # --- cast / pad the batch at the boundary (weights already prepared) ---
    xb = state.astype(jnp.bfloat16)
    if B_pad != B:
        xb = jnp.zeros((B_pad, in_size), jnp.bfloat16).at[:B].set(xb)

    # Weight / bias blocks always map to block (0, 0): VMEM-resident across
    # the batch grid (loaded once, no re-DMA per grid step).
    def resident(a):
        return pl.BlockSpec(a.shape, lambda i: (0, 0))

    out = pl.pallas_call(
        functools.partial(nn_q_kernel, out_size=out_size, silu_bf16=silu_bf16),
        out_shape=jax.ShapeDtypeStruct((B_pad, out_size), jnp.float32),
        grid=(n_b,),
        in_specs=[
            pl.BlockSpec((TB, in_size), lambda i: (i, 0)),   # x tile
            resident(w1b), resident(b1),
            resident(w2b), resident(b2),
            resident(w3p), resident(b3p),
        ],
        out_specs=pl.BlockSpec((TB, out_size), lambda i: (i, 0)),
        compiler_params=pltpu.CompilerParams(
            dimension_semantics=("parallel",)),
    )(xb, w1b, b1, w2b, b2, w3p, b3p)

    return out if B_pad == B else out[:B]


def init_params(key, input_size, output_size, hidden=128):
    """Deterministic init mimicking PyTorch Linear default U(-1/sqrt(fan_in), +)."""
    ks = jax.random.split(key, 6)

    def linear(kw, kb, fan_in, fan_out):
        bound = 1.0 / jnp.sqrt(fan_in)
        # stored as [in, out] (transposed w.r.t. PyTorch's [out, in])
        w = jax.random.uniform(kw, (fan_in, fan_out), jnp.float32, -bound, bound)
        b = jax.random.uniform(kb, (1, fan_out), jnp.float32, -bound, bound)
        return w, b

    w1, b1 = linear(ks[0], ks[1], input_size, hidden)
    w2, b2 = linear(ks[2], ks[3], hidden, hidden)
    w3, b3 = linear(ks[4], ks[5], hidden, output_size)
    return w1, b1, w2, b2, w3, b3


def reference_forward_matched(state, params, *, silu_bf16):
    """Same dtype path as the kernel (bf16 dots, f32 accumulation, tanh SiLU)."""
    w1, b1, w2, b2, w3, b3 = params
    x = state.astype(jnp.bfloat16)
    h1 = jnp.dot(x, w1.astype(jnp.bfloat16),
                 preferred_element_type=jnp.float32) + b1
    h1 = _silu(h1.astype(jnp.bfloat16)) if silu_bf16 else _silu(h1).astype(jnp.bfloat16)
    h2 = jnp.dot(h1, w2.astype(jnp.bfloat16),
                 preferred_element_type=jnp.float32) + b2
    h2 = _silu(h2.astype(jnp.bfloat16)) if silu_bf16 else _silu(h2).astype(jnp.bfloat16)
    return jnp.dot(h2, w3.astype(jnp.bfloat16),
                   preferred_element_type=jnp.float32) + b3


def reference_forward_f32(state, params):
    w1, b1, w2, b2, w3, b3 = params
    h1 = state @ w1 + b1
    h1 = h1 * jax.nn.sigmoid(h1)
    h2 = h1 @ w2 + b2
    h2 = h2 * jax.nn.sigmoid(h2)
    return h2 @ w3 + b3


if __name__ == "__main__":
    key = jax.random.PRNGKey(0)
    k_in, k_in2, k_p = jax.random.split(key, 3)

    input_size = 8      # small state vector
    output_size = 4     # number of discrete actions
    params = init_params(k_p, input_size, output_size)
    prepped = prepare_params(params)          # one-time, outside the hot path
    silu_bf16 = _default_silu_bf16()

    # --- small RL-style batch (B=2): single grid step, padded to 8 rows ---
    state_small = jax.random.normal(k_in, (2, input_size), dtype=jnp.float32)
    out_small = jax.block_until_ready(
        nn_q_forward(state_small, prepped, out_size=output_size,
                     silu_bf16=silu_bf16))
    assert out_small.shape == (2, output_size)
    ref_small = reference_forward_matched(state_small, params, silu_bf16=silu_bf16)
    assert jnp.allclose(out_small, ref_small, atol=2e-2, rtol=2e-2)
    # sanity vs the pure-f32 reference (bf16 dot / activation tolerance)
    assert jnp.allclose(out_small, reference_forward_f32(state_small, params),
                        atol=8e-2, rtol=8e-2)

    # --- larger batch: exercises batch padding (600 -> 608 rows) ---
    state_big = jax.random.normal(k_in2, (600, input_size), dtype=jnp.float32)
    out_big = jax.block_until_ready(
        nn_q_forward(state_big, prepped, out_size=output_size,
                     silu_bf16=silu_bf16))
    assert out_big.shape == (600, output_size)
    ref_big = reference_forward_matched(state_big, params, silu_bf16=silu_bf16)
    assert jnp.allclose(out_big, ref_big, atol=2e-2, rtol=2e-2)

    # --- multi-tile grid path (n_b >= 2, ragged last tile) ---
    state_grid = jax.random.normal(k_in2, (2500, input_size), dtype=jnp.float32)
    out_grid = jax.block_until_ready(
        nn_q_forward(state_grid, prepped, out_size=output_size, block_b=1024,
                     silu_bf16=silu_bf16))
    assert out_grid.shape == (2500, output_size)
    ref_grid = reference_forward_matched(state_grid, params, silu_bf16=silu_bf16)
    assert jnp.allclose(out_grid, ref_grid, atol=2e-2, rtol=2e-2)

    print("KERNEL_OK")
</pallas_src>

<mosaic_0001>
module attributes {stable_mosaic.version = 11 : i64} {
  func.func @nn_q_kernel(%arg0: i32, %arg1: memref<8x8xbf16, #tpu.memory_space<vmem>>, %arg2: memref<8x128xbf16, #tpu.memory_space<vmem>>, %arg3: memref<1x128xf32, #tpu.memory_space<vmem>>, %arg4: memref<128x128xbf16, #tpu.memory_space<vmem>>, %arg5: memref<1x128xf32, #tpu.memory_space<vmem>>, %arg6: memref<128x128xbf16, #tpu.memory_space<vmem>>, %arg7: memref<1x128xf32, #tpu.memory_space<vmem>>, %arg8: memref<8x4xf32, #tpu.memory_space<vmem>>) attributes {dimension_semantics = [#tpu.dimension_semantics<parallel>], iteration_bounds = array<i64: 1>, scalar_prefetch = 0 : i64, scratch_operands = 0 : i64, tpu.core_type = #tpu.core_type<tc>, window_params = [{transform_indices = @transform_0, window_bounds = array<i64: 8, 8>}, {pipeline_mode = #tpu.pipeline_mode<synchronous>, transform_indices = @transform_1, window_bounds = array<i64: 8, 128>}, {pipeline_mode = #tpu.pipeline_mode<synchronous>, transform_indices = @transform_2, window_bounds = array<i64: 1, 128>}, {pipeline_mode = #tpu.pipeline_mode<synchronous>, transform_indices = @transform_3, window_bounds = array<i64: 128, 128>}, {pipeline_mode = #tpu.pipeline_mode<synchronous>, transform_indices = @transform_4, window_bounds = array<i64: 1, 128>}, {pipeline_mode = #tpu.pipeline_mode<synchronous>, transform_indices = @transform_5, window_bounds = array<i64: 128, 128>}, {pipeline_mode = #tpu.pipeline_mode<synchronous>, transform_indices = @transform_6, window_bounds = array<i64: 1, 128>}, {transform_indices = @transform_7, window_bounds = array<i64: 8, 4>}]} {
    %c0 = arith.constant 0 : index
    %c0_0 = arith.constant 0 : index
    %0 = vector.load %arg1[%c0, %c0_0] : memref<8x8xbf16, #tpu.memory_space<vmem>>, vector<8x8xbf16>
    %c0_1 = arith.constant 0 : index
    %c0_2 = arith.constant 0 : index
    %1 = vector.load %arg2[%c0_1, %c0_2] : memref<8x128xbf16, #tpu.memory_space<vmem>>, vector<8x128xbf16>
    %cst = arith.constant dense<0.000000e+00> : vector<8x128xf32>
    %2 = tpu.matmul %0, %1, %cst {dimension_numbers = #tpu.dot_dimension_numbers<[1], [0], [0], [1], [0, 0, 1, 1], [], []>} : vector<8x8xbf16>, vector<8x128xbf16>, vector<8x128xf32> -> vector<8x128xf32>
    %c0_3 = arith.constant 0 : index
    %c0_4 = arith.constant 0 : index
    %3 = vector.load %arg3[%c0_3, %c0_4] : memref<1x128xf32, #tpu.memory_space<vmem>>, vector<1x128xf32>
    %4 = vector.broadcast %3 : vector<1x128xf32> to vector<8x128xf32>
    %5 = arith.addf %2, %4 : vector<8x128xf32>
    %cst_5 = arith.constant 5.000000e-01 : f32
    %6 = vector.broadcast %cst_5 : f32 to vector<8x128xf32>
    %7 = arith.mulf %6, %5 : vector<8x128xf32>
    %8 = math.tanh %7 : vector<8x128xf32>
    %cst_6 = arith.constant 1.000000e+00 : f32
    %9 = vector.broadcast %cst_6 : f32 to vector<8x128xf32>
    %10 = arith.addf %8, %9 : vector<8x128xf32>
    %cst_7 = arith.constant 5.000000e-01 : f32
    %11 = vector.broadcast %cst_7 : f32 to vector<8x128xf32>
    %12 = arith.mulf %11, %10 : vector<8x128xf32>
    %13 = arith.mulf %5, %12 : vector<8x128xf32>
    %14 = arith.truncf %13 : vector<8x128xf32> to vector<8x128xbf16>
    %c0_8 = arith.constant 0 : index
    %c0_9 = arith.constant 0 : index
    %15 = vector.load %arg4[%c0_8, %c0_9] : memref<128x128xbf16, #tpu.memory_space<vmem>>, vector<128x128xbf16>
    %cst_10 = arith.constant dense<0.000000e+00> : vector<8x128xf32>
    %16 = tpu.matmul %14, %15, %cst_10 {dimension_numbers = #tpu.dot_dimension_numbers<[1], [0], [0], [1], [0, 0, 1, 1], [], []>} : vector<8x128xbf16>, vector<128x128xbf16>, vector<8x128xf32> -> vector<8x128xf32>
    %c0_11 = arith.constant 0 : index
    %c0_12 = arith.constant 0 : index
    %17 = vector.load %arg5[%c0_11, %c0_12] : memref<1x128xf32, #tpu.memory_space<vmem>>, vector<1x128xf32>
    %18 = vector.broadcast %17 : vector<1x128xf32> to vector<8x128xf32>
    %19 = arith.addf %16, %18 : vector<8x128xf32>
    %cst_13 = arith.constant 5.000000e-01 : f32
    %20 = vector.broadcast %cst_13 : f32 to vector<8x128xf32>
    %21 = arith.mulf %20, %19 : vector<8x128xf32>
    %22 = math.tanh %21 : vector<8x128xf32>
    %cst_14 = arith.constant 1.000000e+00 : f32
    %23 = vector.broadcast %cst_14 : f32 to vector<8x128xf32>
    %24 = arith.addf %22, %23 : vector<8x128xf32>
    %cst_15 = arith.constant 5.000000e-01 : f32
    %25 = vector.broadcast %cst_15 : f32 to vector<8x128xf32>
    %26 = arith.mulf %25, %24 : vector<8x128xf32>
    %27 = arith.mulf %19, %26 : vector<8x128xf32>
    %28 = arith.truncf %27 : vector<8x128xf32> to vector<8x128xbf16>
    %c0_16 = arith.constant 0 : index
    %c0_17 = arith.constant 0 : index
    %29 = vector.load %arg6[%c0_16, %c0_17] : memref<128x128xbf16, #tpu.memory_space<vmem>>, vector<128x128xbf16>
    %cst_18 = arith.constant dense<0.000000e+00> : vector<8x128xf32>
    %30 = tpu.matmul %28, %29, %cst_18 {dimension_numbers = #tpu.dot_dimension_numbers<[1], [0], [0], [1], [0, 0, 1, 1], [], []>} : vector<8x128xbf16>, vector<128x128xbf16>, vector<8x128xf32> -> vector<8x128xf32>
    %c0_19 = arith.constant 0 : index
    %c0_20 = arith.constant 0 : index
    %31 = vector.load %arg7[%c0_19, %c0_20] : memref<1x128xf32, #tpu.memory_space<vmem>>, vector<1x128xf32>
    %32 = vector.broadcast %31 : vector<1x128xf32> to vector<8x128xf32>
    %33 = arith.addf %30, %32 : vector<8x128xf32>
    %34 = vector.extract_strided_slice %33 {offsets = [0, 0], sizes = [8, 4], strides = [1, 1]} : vector<8x128xf32> to vector<8x4xf32>
    %c0_21 = arith.constant 0 : index
    %c0_22 = arith.constant 0 : index
    %35 = vector.load %arg8[%c0_21, %c0_22] : memref<8x4xf32, #tpu.memory_space<vmem>>, vector<8x4xf32>
    tpu.vector_store %arg8[%c0_21, %c0_22], %34 {strides = array<i32>} : memref<8x4xf32, #tpu.memory_space<vmem>>, vector<8x4xf32>,
    return
  }
  func.func @transform_0(%arg0: i32) -> (i32, i32) {
    %c0_i32 = arith.constant 0 : i32
    %c0_i32_0 = arith.constant 0 : i32
    return %arg0, %c0_i32 : i32, i32
  }
  func.func @transform_1(%arg0: i32) -> (i32, i32) {
    %c0_i32 = arith.constant 0 : i32
    %c0_i32_0 = arith.constant 0 : i32
    %c0_i32_1 = arith.constant 0 : i32
    return %c0_i32, %c0_i32_0 : i32, i32
  }
  func.func @transform_2(%arg0: i32) -> (i32, i32) {
    %c0_i32 = arith.constant 0 : i32
    %c0_i32_0 = arith.constant 0 : i32
    %c0_i32_1 = arith.constant 0 : i32
    return %c0_i32, %c0_i32_0 : i32, i32
  }
  func.func @transform_3(%arg0: i32) -> (i32, i32) {
    %c0_i32 = arith.constant 0 : i32
    %c0_i32_0 = arith.constant 0 : i32
    %c0_i32_1 = arith.constant 0 : i32
    return %c0_i32, %c0_i32_0 : i32, i32
  }
  func.func @transform_4(%arg0: i32) -> (i32, i32) {
    %c0_i32 = arith.constant 0 : i32
    %c0_i32_0 = arith.constant 0 : i32
    %c0_i32_1 = arith.constant 0 : i32
    return %c0_i32, %c0_i32_0 : i32, i32
  }
  func.func @transform_5(%arg0: i32) -> (i32, i32) {
    %c0_i32 = arith.constant 0 : i32
    %c0_i32_0 = arith.constant 0 : i32
    %c0_i32_1 = arith.constant 0 : i32
    return %c0_i32, %c0_i32_0 : i32, i32
  }
  func.func @transform_6(%arg0: i32) -> (i32, i32) {
    %c0_i32 = arith.constant 0 : i32
    %c0_i32_0 = arith.constant 0 : i32
    %c0_i32_1 = arith.constant 0 : i32
    return %c0_i32, %c0_i32_0 : i32, i32
  }
  func.func @transform_7(%arg0: i32) -> (i32, i32) {
    %c0_i32 = arith.constant 0 : i32
    %c0_i32_0 = arith.constant 0 : i32
    return %arg0, %c0_i32 : i32, i32
  }
}

</mosaic_0001>

<bundles_post_ra>
// kernel: nn_q_forward.1
= control target key start
LH: loop header
LB: loop body
LE: loop exit
PB: predicated region body
PF: predicated region fallthrough
CT: control target
= control target key end

     0   :  { %12 = vsyncpa [#allocation3], 0  ;;  %s600_s0 = inlined_call_operand.vmem [shape: bf16[8,8], index: 0, kind: input, shape index: {}]   ;;  %s601_s1 = inlined_call_operand.vmem [shape: bf16[8,128], index: 1, kind: input, shape index: {}]   ;;  %s602_s2 = inlined_call_operand.vmem [shape: f32[1,128], index: 2, kind: input, shape index: {}]   ;;  %s603_s3 = inlined_call_operand.hbm [shape: bf16[128,128], index: 3, kind: input, shape index: {}]   ;;  %s604_s4 = inlined_call_operand.vmem [shape: f32[1,128], index: 4, kind: input, shape index: {}]   ;;  %s605_s5 = inlined_call_operand.hbm [shape: bf16[128,128], index: 5, kind: input, shape index: {}]   ;;  %s606_s6 = inlined_call_operand.vmem [shape: f32[1,128], index: 6, kind: input, shape index: {}]   ;;  %s607_s7 = inlined_call_operand.vmem [shape: f32[8,4], index: 7, kind: output, shape index: {}]  }
   0x1   :  { %13 = vsyncpa [#allocation5], 0  ;;  %s510_s24 = smov [#allocation2]  }
   0x2   :  { %s25_s25 = sshll.u32 %s510_s24, 4  ;;  %s26_s25 = int_to_ptr.vmem [resolvable:$true] %s25_s25 }
   0x3   :  { %s474_s26 = scalar_lea.vmem %s26_s25, 1024  ;;  %p479_p1 = scmp.lt.s32.totalorder %s26_s25, %s26_s25 }
   0x4   :  { %p475_p0 = scmp.ne.s32.totalorder %s26_s25, %s474_s26  ;;  %p480_p2 = scmp.lt.s32.totalorder %s474_s26, %s474_s26 }
   0x6   :  { %p481_p3 = por %p480_p2, %p479_p1 }
   0x8   :  { %p482_p4 = pnand %p481_p3, %p475_p0 }
   0xa   :  { %485 = shalt.err (!%p482_p4)
}
   0xb   :  { %s511_s27 = smov 64   ;;  %s512_s28 = smov 4  }
   0xc   :  { %31 = dma.hbm_to_vmem [thread:$0]  %s603_s3, 1024, %s26_s25, [#allocation3], %s511_s27, %s511_s27, %s512_s28  }
   0xd   :  { %s513_s8 = smov [#allocation4]  }
   0xe   :  { %s39_s9 = sshll.u32 %s513_s8, 4  ;;  %s40_s9 = int_to_ptr.vmem [resolvable:$true] %s39_s9 }
   0xf   :  { %s494_s10 = scalar_lea.vmem %s40_s9, 1024  ;;  %p499_p6 = scmp.lt.s32.totalorder %s40_s9, %s40_s9 }
  0x10   :  { %p495_p5 = scmp.ne.s32.totalorder %s40_s9, %s494_s10  ;;  %p500_p7 = scmp.lt.s32.totalorder %s494_s10, %s494_s10 }
  0x12   :  { %p501_p8 = por %p500_p7, %p499_p6 }
  0x14   :  { %p502_p9 = pnand %p501_p8, %p495_p5 }
  0x16   :  { %505 = shalt.err (!%p502_p9)
}
  0x17   :  { %45 = dma.hbm_to_vmem [thread:$0]  %s605_s5, 1024, %s40_s9, [#allocation5], %s511_s27, %s511_s27, %s512_s28  }
  0x18   :  { %506 = dma.done.wait [#allocation3], 1024  }
  0x19   :  { %507 = vsyncadd [#allocation3], 4294966272 }
  0x1a   :  { %508 = dma.done.wait [#allocation5], 1024  }
  0x1b   :  { %509 = vsyncadd [#allocation5], 4294966272  ;;  %v514_v0 = vmov 0.0   ;;  %vm515_vm0 = vmmov 0   ;;  %vm68_vm1 = vcmask 1043456   ;;  %vm64_vm2 = vcmask 64512  }
  0x1c   :  { %394 = vmatprep.subr.bf16.mxu0 %v514_v0  ;;  %396 = vmatprep.mubr.msk.bf16.mxu0 %vm515_vm0, %v514_v0  ;;  %v56_v1 = vld [vmem:[%s601_s1] sm:$0xf]  ;;  %v446_v4 = vld [vmem:[#allocation2 + $0x38] sm:$0xff]   ;;  %v447_v5 = vld [vmem:[#allocation2 + $0x30] sm:$0xff]   ;;  %vm346_vm3 = vcmask 31744  }
  0x1d   :  { %400 = vmatprep.subr.bf16.mxu1 %v514_v0  ;;  %416 = vmatprep.mubr.msk.bf16.mxu1 %vm515_vm0, %v514_v0  ;;  %v70_v2 = vsel %vm68_vm1, %v56_v1, 0  ;;  %v55_v3 = vld [vmem:[%s600_s0] sm:$0xf]  ;;  %v448_v6 = vld [vmem:[#allocation2 + $0x28] sm:$0xff]   ;;  %v450_v8 = vld [vmem:[#allocation2 + $0x18] sm:$0xff]  }
  0x1e   :  { %395 = vmatpush3.bf16.msra.mxu0 %v70_v2  ;;  %401 = vmatpush3.bf16.msra.mxu1 %v446_v4  ;;  %v449_v7 = vld [vmem:[#allocation2 + $0x20] sm:$0xff]   ;;  %v451_v9 = vld [vmem:[#allocation2 + $0x10] sm:$0xff]   ;;  %v452_v10 = vld [vmem:[#allocation2 + $0x8] sm:$0xff]  }
  0x1f   :  { %420 = vmatprep.subr.bf16.mxu0 %v514_v0  ;;  %402 = vmatprep.subr.bf16.mxu1 %v514_v0  ;;  %v453_v11 = vld [vmem:[#allocation2] sm:$0xff]   ;;  %v454_v12 = vld [vmem:[#allocation4 + $0x38] sm:$0xff]   ;;  %v455_v25 = vld [vmem:[#allocation4 + $0x30] sm:$0xff]  }
  0x20   :  { %v354_v13 = vld [vmem:[%s602_s2] ss:$0 sm:$0xff]  ;;  %v456_v26 = vld [vmem:[#allocation4 + $0x28] sm:$0xff]   ;;  %v458_v28 = vld [vmem:[#allocation4 + $0x18] sm:$0xff]  }
  0x21   :  { %397 = vmatmul.mubr.msk.bf16.vlgmr.msra.gmra.mxu0 %vm64_vm2, %v55_v3  ;;  %v457_v27 = vld [vmem:[#allocation4 + $0x20] sm:$0xff]   ;;  %v459_v29 = vld [vmem:[#allocation4 + $0x10] sm:$0xff]   ;;  %v460_v30 = vld [vmem:[#allocation4 + $0x8] sm:$0xff]  }
  0x22   :  { %436 = vmatprep.mubr.msk.bf16.mxu0 %vm515_vm0, %v514_v0  ;;  %403 = vmatpush3.bf16.msra.mxu1 %v447_v5  ;;  %v461_v31 = vld [vmem:[#allocation4] sm:$0xff]  }
  0x23   :  { %404 = vmatprep.subr.bf16.mxu1 %v514_v0  ;;  %421 = vmatpush3.bf16.msra.mxu0 %v454_v12  ;;  %v356_v32 = vld [vmem:[%s604_s4] ss:$0 sm:$0xff] }
  0x24   :  { %422 = vmatprep.subr.bf16.mxu0 %v514_v0  ;;  %v365_v44 = vld [vmem:[%s606_s6] ss:$0 sm:$0xff] }
  0x26   :  { %405 = vmatpush3.bf16.msra.mxu1 %v448_v6 }
  0x27   :  { %406 = vmatprep.subr.bf16.mxu1 %v514_v0  ;;  %423 = vmatpush3.bf16.msra.mxu0 %v455_v25 }
  0x28   :  { %424 = vmatprep.subr.bf16.mxu0 %v514_v0 }
  0x2a   :  { %407 = vmatpush3.bf16.msra.mxu1 %v449_v7 }
  0x2b   :  { %408 = vmatprep.subr.bf16.mxu1 %v514_v0  ;;  %425 = vmatpush3.bf16.msra.mxu0 %v456_v26 }
  0x2c   :  { %426 = vmatprep.subr.bf16.mxu0 %v514_v0 }
  0x2e   :  { %409 = vmatpush3.bf16.msra.mxu1 %v450_v8 }
  0x2f   :  { %410 = vmatprep.subr.bf16.mxu1 %v514_v0  ;;  %427 = vmatpush3.bf16.msra.mxu0 %v457_v27 }
  0x30   :  { %428 = vmatprep.subr.bf16.mxu0 %v514_v0 }
  0x32   :  { %411 = vmatpush3.bf16.msra.mxu1 %v451_v9 }
  0x33   :  { %412 = vmatprep.subr.bf16.mxu1 %v514_v0  ;;  %429 = vmatpush3.bf16.msra.mxu0 %v458_v28 }
  0x34   :  { %430 = vmatprep.subr.bf16.mxu0 %v514_v0 }
  0x36   :  { %413 = vmatpush3.bf16.msra.mxu1 %v452_v10 }
  0x37   :  { %414 = vmatprep.subr.bf16.mxu1 %v514_v0  ;;  %431 = vmatpush3.bf16.msra.mxu0 %v459_v29 }
  0x38   :  { %432 = vmatprep.subr.bf16.mxu0 %v514_v0 }
  0x3a   :  { %415 = vmatpush3.bf16.msra.mxu1 %v453_v11 }
  0x3b   :  { %433 = vmatpush3.bf16.msra.mxu0 %v460_v30 }
  0x3c   :  { %434 = vmatprep.subr.bf16.mxu0 %v514_v0 }
  0x3f   :  { %435 = vmatpush3.bf16.msra.mxu0 %v461_v31 }
  0xe1   :  { %v106_v14 = vpop.f32.mrf.mxu0 }
  0xe2   :  { %v107_v15 = vadd.f32 %v354_v13, %v106_v14 }
  0xe3   :  { %v398_v16 = vpop.f32.mrf.mxu0 }
  0xe4   :  { %v112_v17 = vmul.f32 0.5, %v107_v15 }
  0xe5   :  { %v109_v18 = vpop.f32.mrf.mxu0 }
  0xe6   :  { %462 = vtanh.f32 %v112_v17 }
  0xe7   :  { %v399_v19 = vpop.f32.mrf.mxu0 }
  0xf3   :  { %v463_v20 = vpop.eup %462 }
  0xf4   :  { %v114_v21 = vadd.f32 1.0, %v463_v20 }
  0xf6   :  { %v115_v22 = vmul.f32 0.5, %v114_v21 }
  0xf8   :  { %v116_v23 = vmul.f32 %v115_v22, %v107_v15 }
  0xfa   :  { %v117_v24 = vpack.c.bf16 %v116_v23, %v116_v23 }
  0xfc   :  { %417 = vmatmul.mubr.bf16.vlgmr.msra.gmra.mxu1 %v117_v24 }
 0x1bc   :  { %v223_v33 = vpop.f32.mrf.mxu1 }
 0x1bd   :  { %v224_v34 = vadd.f32 %v356_v32, %v223_v33 }
 0x1be   :  { %v418_v35 = vpop.f32.mrf.mxu1 }
 0x1bf   :  { %v229_v36 = vmul.f32 0.5, %v224_v34 }
 0x1c0   :  { %v226_v37 = vpop.f32.mrf.mxu1 }
 0x1c1   :  { %464 = vtanh.f32 %v229_v36 }
 0x1c2   :  { %v419_v38 = vpop.f32.mrf.mxu1 }
 0x1ce   :  { %v465_v39 = vpop.eup %464 }
 0x1cf   :  { %v231_v40 = vadd.f32 1.0, %v465_v39 }
 0x1d1   :  { %v232_v41 = vmul.f32 0.5, %v231_v40 }
 0x1d3   :  { %v233_v42 = vmul.f32 %v232_v41, %v224_v34 }
 0x1d5   :  { %v234_v43 = vpack.c.bf16 %v233_v42, %v233_v42 }
 0x1d7   :  { %437 = vmatmul.mubr.bf16.vlgmr.msra.gmra.mxu0 %v234_v43 }
 0x297   :  { %v340_v45 = vpop.f32.mrf.mxu0 }
 0x298   :  { %v341_v46 = vadd.f32 %v365_v44, %v340_v45 }
 0x299   :  { %v438_v47 = vpop.f32.mrf.mxu0 }
 0x29a   :  { %347 = vst.msk [vmem:[%s607_s7] sm:$0xff] %vm346_vm3, %v341_v46 }
 0x29b   :  { %v343_v48 = vpop.f32.mrf.mxu0 }
 0x29d   :  { %v439_v49 = vpop.f32.mrf.mxu0 }
 0x29e   :  { %352 = vsyncpa [#allocation3], 1 }
 0x29f   :  { %353 = vsyncpa [#allocation5], 1 }

</bundles_post_ra>
